<compile_context>
chip_gen: v6e
topology: v6e:2x2x1
jax: 0.10.0
libtpu: 0.0.40
codegen_flags: <defaults>
</compile_context>

<pallas_src>
import math

import jax
import jax.numpy as jnp
from jax import lax
from jax.experimental import pallas as pl
from jax.experimental.pallas import tpu as pltpu


# ----------------------------- Pallas kernels --------------------------------

_CONTRACT_LAST = (((1,), (1,)), ((), ()))  # contract dim-1 of x with dim-1 of W


def _noisy_linear_kernel(x_ref, wmu_ref, wsig_ref, eps_in_ref, eps_out_ref,
                         bmu_ref, bsig_ref, beps_ref, o_ref):
    # x: (TB, K); W*: (TN, K); eps_in: (1, K); eps_out / b*: (1, TN)
    x = x_ref[...]
    x_noisy = x * eps_in_ref[...]                                  # VPU, (TB, K)
    mu_out = lax.dot_general(x, wmu_ref[...], _CONTRACT_LAST,
                             preferred_element_type=jnp.float32)   # (TB, TN)
    sig_out = lax.dot_general(x_noisy, wsig_ref[...], _CONTRACT_LAST,
                              preferred_element_type=jnp.float32)  # (TB, TN)
    bias = bmu_ref[...] + bsig_ref[...] * beps_ref[...]            # (1, TN)
    o_ref[...] = mu_out + sig_out * eps_out_ref[...] + bias


def _plain_linear_kernel(x_ref, wmu_ref, bmu_ref, o_ref):
    # Eval-mode forward: F.linear(x, weight_mu, bias_mu)
    o_ref[...] = lax.dot_general(x_ref[...], wmu_ref[...], _CONTRACT_LAST,
                                 preferred_element_type=jnp.float32) + bmu_ref[...]


# ------------------------------ wrapper ---------------------------------------

def _round_up(x, m):
    return (x + m - 1) // m * m


def _pad2(a, rows, cols):
    return jnp.pad(a, ((0, rows - a.shape[0]), (0, cols - a.shape[1])))


def noisy_linear_forward(x, params, *, training=True, block_b=128, block_n=256):
    """Forward pass of NoisyLinear via pallas_call.

    x: (B, in_features) float32
    params: dict from init_noisy_linear.
    """
    x = x.astype(jnp.float32)
    B, in_f = x.shape
    out_f = params["weight_mu"].shape[0]

    # Padded / tiled geometry: lane-dense K and N (multiples of 128),
    # M tile a multiple of 8 (sublane), capped by block_b.
    K = _round_up(in_f, 128)
    tile_n = min(block_n, _round_up(out_f, 128))
    N = _round_up(out_f, tile_n)
    tile_b = min(block_b, _round_up(B, 8))
    Bp = _round_up(B, tile_b)

    xp = _pad2(x, Bp, K)
    wmu = _pad2(params["weight_mu"], N, K)
    bmu = _pad2(params["bias_mu"], 1, N)

    grid = (Bp // tile_b, N // tile_n)
    x_spec = pl.BlockSpec((tile_b, K), lambda i, j: (i, 0))
    w_spec = pl.BlockSpec((tile_n, K), lambda i, j: (j, 0))
    kvec_spec = pl.BlockSpec((1, K), lambda i, j: (0, 0))
    nvec_spec = pl.BlockSpec((1, tile_n), lambda i, j: (0, j))
    o_spec = pl.BlockSpec((tile_b, tile_n), lambda i, j: (i, j))

    compiler_params = pltpu.CompilerParams(
        dimension_semantics=("parallel", "parallel"),
        vmem_limit_bytes=32 * 1024 * 1024)

    if training:
        wsig = _pad2(params["weight_sigma"], N, K)
        eps_in = _pad2(params["eps_in"], 1, K)
        eps_out = _pad2(params["eps_out"], 1, N)
        bsig = _pad2(params["bias_sigma"], 1, N)
        beps = _pad2(params["bias_epsilon"], 1, N)

        cost = pl.CostEstimate(
            flops=2 * 2 * Bp * K * N,               # two matmuls
            transcendentals=0,
            bytes_accessed=4 * (Bp * K + 2 * N * K + Bp * N))
        fn = pl.pallas_call(
            _noisy_linear_kernel,
            out_shape=jax.ShapeDtypeStruct((Bp, N), jnp.float32),
            grid=grid,
            in_specs=[x_spec, w_spec, w_spec, kvec_spec,
                      nvec_spec, nvec_spec, nvec_spec, nvec_spec],
            out_specs=o_spec,
            compiler_params=compiler_params,
            cost_estimate=cost,
        )
        out = fn(xp, wmu, wsig, eps_in, eps_out, bmu, bsig, beps)
    else:
        cost = pl.CostEstimate(
            flops=2 * Bp * K * N,
            transcendentals=0,
            bytes_accessed=4 * (Bp * K + N * K + Bp * N))
        fn = pl.pallas_call(
            _plain_linear_kernel,
            out_shape=jax.ShapeDtypeStruct((Bp, N), jnp.float32),
            grid=grid,
            in_specs=[x_spec, w_spec, nvec_spec],
            out_specs=o_spec,
            compiler_params=compiler_params,
            cost_estimate=cost,
        )
        out = fn(xp, wmu, bmu)

    return out[:B, :out_f]


# ------------------------ parameter / noise init -----------------------------

def _scale_noise(key, size):
    x = jax.random.normal(key, (size,), dtype=jnp.float32)
    return jnp.sign(x) * jnp.sqrt(jnp.abs(x))


def init_noisy_linear(key, in_features, out_features, std_init=0.4):
    k_wmu, k_bmu, k_eps_in, k_eps_out, k_beps = jax.random.split(key, 5)
    mu_range = 1.0 / math.sqrt(in_features)

    weight_mu = jax.random.uniform(
        k_wmu, (out_features, in_features), jnp.float32,
        minval=-mu_range, maxval=mu_range)
    weight_sigma = jnp.full((out_features, in_features),
                            std_init / math.sqrt(in_features), jnp.float32)
    bias_mu = jax.random.uniform(
        k_bmu, (out_features,), jnp.float32,
        minval=-mu_range, maxval=mu_range)
    bias_sigma = jnp.full((out_features,),
                          std_init / math.sqrt(out_features), jnp.float32)

    eps_in = _scale_noise(k_eps_in, in_features)
    eps_out = _scale_noise(k_eps_out, out_features)
    weight_epsilon = jnp.outer(eps_out, eps_in)        # mirrors the torch buffer
    bias_epsilon = _scale_noise(k_beps, out_features)

    return {
        "weight_mu": weight_mu,
        "weight_sigma": weight_sigma,
        "weight_epsilon": weight_epsilon,    # kept for reference / parity checks
        "eps_in": eps_in[None, :],           # factors used by the kernel
        "eps_out": eps_out[None, :],
        "bias_mu": bias_mu[None, :],         # 2D (1, out) for lane-dense tiles
        "bias_sigma": bias_sigma[None, :],
        "bias_epsilon": bias_epsilon[None, :],
    }


# ---------------------------------- main -------------------------------------

if __name__ == "__main__":
    key = jax.random.PRNGKey(0)
    k_params, k_x = jax.random.split(key)

    in_features, out_features = 32, 64
    batch = 16

    params = init_noisy_linear(k_params, in_features, out_features,
                               std_init=0.4)
    x = jax.random.normal(k_x, (batch, in_features), dtype=jnp.float32)

    # training-mode forward (factorized noisy weights, fused in the kernel)
    out_train = noisy_linear_forward(x, params, training=True)
    out_train = jax.block_until_ready(out_train)

    # eval-mode forward (plain linear with mu parameters)
    out_eval = noisy_linear_forward(x, params, training=False)
    out_eval = jax.block_until_ready(out_eval)

    # correctness checks against plain-JAX reference (materialized epsilon,
    # exactly as the PyTorch module's forward computes it)
    w = params["weight_mu"] + params["weight_sigma"] * params["weight_epsilon"]
    b = params["bias_mu"] + params["bias_sigma"] * params["bias_epsilon"]
    ref_train = x @ w.T + b
    ref_eval = x @ params["weight_mu"].T + params["bias_mu"]
    assert out_train.shape == (batch, out_features)
    assert out_train.dtype == jnp.float32
    assert jnp.allclose(out_train, ref_train, atol=1e-4, rtol=1e-4)
    assert jnp.allclose(out_eval, ref_eval, atol=1e-4, rtol=1e-4)

    print("KERNEL_OK")
</pallas_src>

<mosaic_0001>
module attributes {stable_mosaic.version = 11 : i64} {
  func.func @_noisy_linear_kernel(%arg0: i32, %arg1: i32, %arg2: memref<16x128xf32, #tpu.memory_space<vmem>>, %arg3: memref<128x128xf32, #tpu.memory_space<vmem>>, %arg4: memref<128x128xf32, #tpu.memory_space<vmem>>, %arg5: memref<1x128xf32, #tpu.memory_space<vmem>>, %arg6: memref<1x128xf32, #tpu.memory_space<vmem>>, %arg7: memref<1x128xf32, #tpu.memory_space<vmem>>, %arg8: memref<1x128xf32, #tpu.memory_space<vmem>>, %arg9: memref<1x128xf32, #tpu.memory_space<vmem>>, %arg10: memref<16x128xf32, #tpu.memory_space<vmem>>) attributes {dimension_semantics = [#tpu.dimension_semantics<parallel>, #tpu.dimension_semantics<parallel>], iteration_bounds = array<i64: 1, 1>, scalar_prefetch = 0 : i64, scratch_operands = 0 : i64, tpu.core_type = #tpu.core_type<tc>, window_params = [{transform_indices = @transform_0, window_bounds = array<i64: 16, 128>}, {transform_indices = @transform_1, window_bounds = array<i64: 128, 128>}, {transform_indices = @transform_2, window_bounds = array<i64: 128, 128>}, {pipeline_mode = #tpu.pipeline_mode<synchronous>, transform_indices = @transform_3, window_bounds = array<i64: 1, 128>}, {transform_indices = @transform_4, window_bounds = array<i64: 1, 128>}, {transform_indices = @transform_5, window_bounds = array<i64: 1, 128>}, {transform_indices = @transform_6, window_bounds = array<i64: 1, 128>}, {transform_indices = @transform_7, window_bounds = array<i64: 1, 128>}, {transform_indices = @transform_8, window_bounds = array<i64: 16, 128>}]} {
    %c0 = arith.constant 0 : index
    %c0_0 = arith.constant 0 : index
    %0 = vector.load %arg2[%c0, %c0_0] : memref<16x128xf32, #tpu.memory_space<vmem>>, vector<16x128xf32>
    %c0_1 = arith.constant 0 : index
    %c0_2 = arith.constant 0 : index
    %1 = vector.load %arg5[%c0_1, %c0_2] : memref<1x128xf32, #tpu.memory_space<vmem>>, vector<1x128xf32>
    %2 = vector.broadcast %1 : vector<1x128xf32> to vector<16x128xf32>
    %3 = arith.mulf %0, %2 : vector<16x128xf32>
    %c0_3 = arith.constant 0 : index
    %c0_4 = arith.constant 0 : index
    %4 = vector.load %arg3[%c0_3, %c0_4] : memref<128x128xf32, #tpu.memory_space<vmem>>, vector<128x128xf32>
    %cst = arith.constant dense<0.000000e+00> : vector<16x128xf32>
    %5 = tpu.matmul %0, %4, %cst {dimension_numbers = #tpu.dot_dimension_numbers<[1], [1], [0], [0], [0, 0, 1, 0], [], []>} : vector<16x128xf32>, vector<128x128xf32>, vector<16x128xf32> -> vector<16x128xf32>
    %c0_5 = arith.constant 0 : index
    %c0_6 = arith.constant 0 : index
    %6 = vector.load %arg4[%c0_5, %c0_6] : memref<128x128xf32, #tpu.memory_space<vmem>>, vector<128x128xf32>
    %cst_7 = arith.constant dense<0.000000e+00> : vector<16x128xf32>
    %7 = tpu.matmul %3, %6, %cst_7 {dimension_numbers = #tpu.dot_dimension_numbers<[1], [1], [0], [0], [0, 0, 1, 0], [], []>} : vector<16x128xf32>, vector<128x128xf32>, vector<16x128xf32> -> vector<16x128xf32>
    %c0_8 = arith.constant 0 : index
    %c0_9 = arith.constant 0 : index
    %8 = vector.load %arg7[%c0_8, %c0_9] : memref<1x128xf32, #tpu.memory_space<vmem>>, vector<1x128xf32>
    %c0_10 = arith.constant 0 : index
    %c0_11 = arith.constant 0 : index
    %9 = vector.load %arg8[%c0_10, %c0_11] : memref<1x128xf32, #tpu.memory_space<vmem>>, vector<1x128xf32>
    %c0_12 = arith.constant 0 : index
    %c0_13 = arith.constant 0 : index
    %10 = vector.load %arg9[%c0_12, %c0_13] : memref<1x128xf32, #tpu.memory_space<vmem>>, vector<1x128xf32>
    %11 = arith.mulf %9, %10 : vector<1x128xf32>
    %12 = arith.addf %8, %11 : vector<1x128xf32>
    %c0_14 = arith.constant 0 : index
    %c0_15 = arith.constant 0 : index
    %13 = vector.load %arg6[%c0_14, %c0_15] : memref<1x128xf32, #tpu.memory_space<vmem>>, vector<1x128xf32>
    %14 = vector.broadcast %13 : vector<1x128xf32> to vector<16x128xf32>
    %15 = arith.mulf %7, %14 : vector<16x128xf32>
    %16 = arith.addf %5, %15 : vector<16x128xf32>
    %17 = vector.broadcast %12 : vector<1x128xf32> to vector<16x128xf32>
    %18 = arith.addf %16, %17 : vector<16x128xf32>
    %c0_16 = arith.constant 0 : index
    %c0_17 = arith.constant 0 : index
    %19 = vector.load %arg10[%c0_16, %c0_17] : memref<16x128xf32, #tpu.memory_space<vmem>>, vector<16x128xf32>
    tpu.vector_store %arg10[%c0_16, %c0_17], %18 {strides = array<i32>} : memref<16x128xf32, #tpu.memory_space<vmem>>, vector<16x128xf32>,
    return
  }
  func.func @transform_0(%arg0: i32, %arg1: i32) -> (i32, i32) {
    %c0_i32 = arith.constant 0 : i32
    %c0_i32_0 = arith.constant 0 : i32
    return %arg0, %c0_i32 : i32, i32
  }
  func.func @transform_1(%arg0: i32, %arg1: i32) -> (i32, i32) {
    %c0_i32 = arith.constant 0 : i32
    %c0_i32_0 = arith.constant 0 : i32
    return %arg1, %c0_i32 : i32, i32
  }
  func.func @transform_2(%arg0: i32, %arg1: i32) -> (i32, i32) {
    %c0_i32 = arith.constant 0 : i32
    %c0_i32_0 = arith.constant 0 : i32
    return %arg1, %c0_i32 : i32, i32
  }
  func.func @transform_3(%arg0: i32, %arg1: i32) -> (i32, i32) {
    %c0_i32 = arith.constant 0 : i32
    %c0_i32_0 = arith.constant 0 : i32
    %c0_i32_1 = arith.constant 0 : i32
    return %c0_i32, %c0_i32_0 : i32, i32
  }
  func.func @transform_4(%arg0: i32, %arg1: i32) -> (i32, i32) {
    %c0_i32 = arith.constant 0 : i32
    %c0_i32_0 = arith.constant 0 : i32
    return %c0_i32, %arg1 : i32, i32
  }
  func.func @transform_5(%arg0: i32, %arg1: i32) -> (i32, i32) {
    %c0_i32 = arith.constant 0 : i32
    %c0_i32_0 = arith.constant 0 : i32
    return %c0_i32, %arg1 : i32, i32
  }
  func.func @transform_6(%arg0: i32, %arg1: i32) -> (i32, i32) {
    %c0_i32 = arith.constant 0 : i32
    %c0_i32_0 = arith.constant 0 : i32
    return %c0_i32, %arg1 : i32, i32
  }
  func.func @transform_7(%arg0: i32, %arg1: i32) -> (i32, i32) {
    %c0_i32 = arith.constant 0 : i32
    %c0_i32_0 = arith.constant 0 : i32
    return %c0_i32, %arg1 : i32, i32
  }
  func.func @transform_8(%arg0: i32, %arg1: i32) -> (i32, i32) {
    %c0_i32 = arith.constant 0 : i32
    return %arg0, %arg1 : i32, i32
  }
}

</mosaic_0001>

<bundles_post_ra>
// kernel: tpu_custom_call.1
= control target key start
LH: loop header
LB: loop body
LE: loop exit
PB: predicated region body
PF: predicated region fallthrough
CT: control target
= control target key end

     0   :  { %13 = vsyncpa [#allocation3], 0  ;;  %s600_s0 = inlined_call_operand.hbm [shape: f32[16,128], index: 0, kind: input, shape index: {}]   ;;  %s601_s1 = inlined_call_operand.hbm [shape: f32[128,128], index: 1, kind: input, shape index: {}]   ;;  %s602_s2 = inlined_call_operand.hbm [shape: f32[128,128], index: 2, kind: input, shape index: {}]   ;;  %s603_s3 = inlined_call_operand.vmem [shape: f32[1,128], index: 3, kind: input, shape index: {}]   ;;  %s604_s4 = inlined_call_operand.vmem [shape: f32[1,128], index: 4, kind: input, shape index: {}]   ;;  %s605_s5 = inlined_call_operand.vmem [shape: f32[1,128], index: 5, kind: input, shape index: {}]   ;;  %s606_s6 = inlined_call_operand.vmem [shape: f32[1,128], index: 6, kind: input, shape index: {}]   ;;  %s607_s7 = inlined_call_operand.vmem [shape: f32[1,128], index: 7, kind: input, shape index: {}]   ;;  %s608_s8 = inlined_call_operand.hbm [shape: f32[16,128], index: 8, kind: output, shape index: {}]  }
   0x1   :  { %14 = vsyncpa [#allocation6], 0 }
   0x2   :  { %15 = vsyncpa [#allocation4], 0  ;;  %s506_s27 = smov [#allocation5]   ;;  %s507_s29 = smov [#allocation2]  }
   0x3   :  { %s33_s28 = sshll.u32 %s506_s27, 4  ;;  %s21_s30 = sshll.u32 %s507_s29, 4  ;;  %s34_s28 = int_to_ptr.vmem [resolvable:$true] %s33_s28  ;;  %s22_s30 = int_to_ptr.vmem [resolvable:$true] %s21_s30 }
   0x4   :  { %s428_s9 = scalar_lea.vmem %s34_s28, 2048  ;;  %p433_p1 = scmp.lt.s32.totalorder %s34_s28, %s34_s28 }
   0x5   :  { %p429_p0 = scmp.ne.s32.totalorder %s34_s28, %s428_s9  ;;  %p434_p2 = scmp.lt.s32.totalorder %s428_s9, %s428_s9 }
   0x7   :  { %p435_p3 = por %p434_p2, %p433_p1 }
   0x9   :  { %p436_p4 = pnand %p435_p3, %p429_p0 }
   0xb   :  { %439 = shalt.err (!%p436_p4)
}
   0xc   :  { %s508_s10 = smov 128   ;;  %s509_s11 = smov 8  }
   0xd   :  { %39 = dma.hbm_to_vmem [thread:$0]  %s601_s1, 2048, %s34_s28, [#allocation6], %s508_s10, %s508_s10, %s509_s11  }
   0xe   :  { %s448_s14 = scalar_lea.vmem %s22_s30, 256  ;;  %p453_p6 = scmp.lt.s32.totalorder %s22_s30, %s22_s30 }
   0xf   :  { %p449_p5 = scmp.ne.s32.totalorder %s22_s30, %s448_s14  ;;  %p454_p7 = scmp.lt.s32.totalorder %s448_s14, %s448_s14 }
  0x11   :  { %p455_p8 = por %p454_p7, %p453_p6 }
  0x13   :  { %p456_p9 = pnand %p455_p8, %p449_p5 }
  0x15   :  { %459 = shalt.err (!%p456_p9)
}
  0x16   :  { %27 = dma.hbm_to_vmem [thread:$0]  %s600_s0, 256, %s22_s30, [#allocation3], %s508_s10, %s508_s10, %s509_s11  }
  0x17   :  { %s510_s17 = smov [#allocation7]  }
  0x18   :  { %s45_s18 = sshll.u32 %s510_s17, 4  ;;  %s46_s18 = int_to_ptr.vmem [resolvable:$true] %s45_s18 }
  0x19   :  { %s468_s19 = scalar_lea.vmem %s46_s18, 2048  ;;  %p473_p11 = scmp.lt.s32.totalorder %s46_s18, %s46_s18 }
  0x1a   :  { %p469_p10 = scmp.ne.s32.totalorder %s46_s18, %s468_s19  ;;  %p474_p12 = scmp.lt.s32.totalorder %s468_s19, %s468_s19 }
  0x1c   :  { %p475_p13 = por %p474_p12, %p473_p11 }
  0x1e   :  { %p476_p0 = pnand %p475_p13, %p469_p10 }
  0x20   :  { %479 = shalt.err (!%p476_p0)
}
  0x21   :  { %51 = dma.hbm_to_vmem [thread:$0]  %s602_s2, 2048, %s46_s18, [#allocation6], %s508_s10, %s508_s10, %s509_s11  }
  0x22   :  { %500 = dma.done.wait [#allocation3], 256  }
  0x23   :  { %501 = vsyncadd [#allocation3], 4294967040 }
  0x24   :  { %502 = dma.done.wait [#allocation6], 4096  }
  0x25   :  { %503 = vsyncadd [#allocation6], 4294963200  ;;  %v113_v0 = vld [vmem:[#allocation7 + $0x78] sm:$0xff]  ;;  %v112_v2 = vld [vmem:[#allocation7 + $0x70] sm:$0xff]  ;;  %v279_v37 = vlaneseq }
  0x26   :  { %v97_v1 = vld [vmem:[#allocation5 + $0x78] sm:$0xff]  ;;  %344 = vmatprep.subr.mxu0 %v113_v0  ;;  %v96_v3 = vld [vmem:[#allocation5 + $0x70] sm:$0xff]  ;;  %v111_v4 = vld [vmem:[#allocation7 + $0x68] sm:$0xff] }
  0x27   :  { %379 = vmatprep.subr.mxu1 %v97_v1  ;;  %345 = vmatpush3.xpose.msra.mxu0 %v113_v0  ;;  %v95_v5 = vld [vmem:[#allocation5 + $0x68] sm:$0xff]  ;;  %v110_v6 = vld [vmem:[#allocation7 + $0x60] sm:$0xff]  ;;  %v71_v8 = vld [vmem:[#allocation2] sm:$0xff]  ;;  %v280_v41 = vshrl.u32 %v279_v37, 7 }
  0x28   :  { %380 = vmatpush3.xpose.msra.mxu1 %v97_v1  ;;  %346 = vmatprep.subr.mxu0 %v112_v2  ;;  %v94_v7 = vld [vmem:[#allocation5 + $0x60] sm:$0xff]  ;;  %v578_v9 = vld [vmem:[%s603_s3] ss:$0 sm:$0xff]  ;;  %v109_v10 = vld [vmem:[#allocation7 + $0x58] sm:$0xff] }
  0x29   :  { %381 = vmatprep.subr.mxu1 %v96_v3  ;;  %v93_v11 = vld [vmem:[#allocation5 + $0x58] sm:$0xff]  ;;  %v80_v12 = vmul.f32 %v578_v9, %v71_v8  ;;  %411 = vmatprep.mubr.f32.mxu1 %v71_v8  ;;  %v108_v13 = vld [vmem:[#allocation7 + $0x50] sm:$0xff]  ;;  %v107_v15 = vld [vmem:[#allocation7 + $0x48] sm:$0xff]  ;;  %v281_v44 = vsub.s32 0, %v280_v41 }
  0x2a   :  { %v92_v14 = vld [vmem:[#allocation5 + $0x50] sm:$0xff]  ;;  %v91_v16 = vld [vmem:[#allocation5 + $0x48] sm:$0xff]  ;;  %v106_v17 = vld [vmem:[#allocation7 + $0x40] sm:$0xff] }
  0x2b   :  { %347 = vmatpush3.xpose.msra.mxu0 %v112_v2  ;;  %376 = vmatprep.mubr.f32.mxu0 %v80_v12  ;;  %v90_v18 = vld [vmem:[#allocation5 + $0x40] sm:$0xff]  ;;  %v105_v19 = vld [vmem:[#allocation7 + $0x38] sm:$0xff]  ;;  %v104_v21 = vld [vmem:[#allocation7 + $0x30] sm:$0xff] }
  0x2c   :  { %382 = vmatpush3.xpose.msra.mxu1 %v96_v3  ;;  %348 = vmatprep.subr.mxu0 %v111_v4  ;;  %v89_v20 = vld [vmem:[#allocation5 + $0x38] sm:$0xff]  ;;  %v88_v22 = vld [vmem:[#allocation5 + $0x30] sm:$0xff]  ;;  %v103_v23 = vld [vmem:[#allocation7 + $0x28] sm:$0xff] }
  0x2d   :  { %383 = vmatprep.subr.mxu1 %v95_v5  ;;  %v87_v24 = vld [vmem:[#allocation5 + $0x28] sm:$0xff]  ;;  %v102_v25 = vld [vmem:[#allocation7 + $0x20] sm:$0xff]  ;;  %v101_v27 = vld [vmem:[#allocation7 + $0x18] sm:$0xff] }
  0x2e   :  { %v86_v26 = vld [vmem:[#allocation5 + $0x20] sm:$0xff]  ;;  %v85_v28 = vld [vmem:[#allocation5 + $0x18] sm:$0xff]  ;;  %v100_v29 = vld [vmem:[#allocation7 + $0x10] sm:$0xff] }
  0x2f   :  { %349 = vmatpush3.xpose.msra.mxu0 %v111_v4  ;;  %v84_v30 = vld [vmem:[#allocation5 + $0x10] sm:$0xff]  ;;  %v99_v31 = vld [vmem:[#allocation7 + $0x8] sm:$0xff]  ;;  %v98_v33 = vld [vmem:[#allocation7] sm:$0xff] }
  0x30   :  { %384 = vmatpush3.xpose.msra.mxu1 %v95_v5  ;;  %350 = vmatprep.subr.mxu0 %v110_v6  ;;  %v83_v32 = vld [vmem:[#allocation5 + $0x8] sm:$0xff]  ;;  %v82_v34 = vld [vmem:[#allocation5] sm:$0xff]  ;;  %v72_v35 = vld [vmem:[#allocation2 + $0x8] sm:$0xff] }
  0x31   :  { %385 = vmatprep.subr.mxu1 %v94_v7  ;;  %v81_v36 = vmul.f32 %v578_v9, %v72_v35  ;;  %v190_v38 = vld [vmem:[%s606_s6] sm:$0x1]  ;;  %s511_s6 = smov [#allocation8]  }
  0x32   :  { %v191_v39 = vld [vmem:[%s607_s7] sm:$0x1]  ;;  %s293_s7 = sshll.u32 %s511_s6, 4  ;;  %s294_s7 = int_to_ptr.vmem [resolvable:$true] %s293_s7 }
  0x33   :  { %351 = vmatpush3.xpose.msra.mxu0 %v110_v6  ;;  %v192_v40 = vmul.f32 %v191_v39, %v190_v38  ;;  %v189_v42 = vld [vmem:[%s605_s5] sm:$0x1]  ;;  %s480_s5 = scalar_lea.vmem %s294_s7, 256  ;;  %p485_p2 = scmp.lt.s32.totalorder %s294_s7, %s294_s7 }
  0x34   :  { %386 = vmatpush3.xpose.msra.mxu1 %v94_v7  ;;  %352 = vmatprep.subr.mxu0 %v109_v10  ;;  %v307_v45 = vld [vmem:[%s604_s4] ss:$0 sm:$0xff]  ;;  %p481_p1 = scmp.ne.s32.totalorder %s294_s7, %s480_s5  ;;  %p486_p3 = scmp.lt.s32.totalorder %s480_s5, %s480_s5 }
  0x35   :  { %387 = vmatprep.subr.mxu1 %v93_v11  ;;  %v193_v43 = vadd.f32 %v192_v40, %v189_v42 }
  0x36   :  { %p487_p4 = por %p486_p3, %p485_p2 }
  0x37   :  { %353 = vmatpush3.xpose.msra.mxu0 %v109_v10  ;;  %v282_v49 = vrot.slane %v193_v43, %v281_v44 }
  0x38   :  { %388 = vmatpush3.xpose.msra.mxu1 %v93_v11  ;;  %354 = vmatprep.subr.mxu0 %v108_v13  ;;  %p488_p5 = pnand %p487_p4, %p481_p1 }
  0x39   :  { %389 = vmatprep.subr.mxu1 %v92_v14 }
  0x3b   :  { %355 = vmatpush3.xpose.msra.mxu0 %v108_v13 }
  0x3c   :  { %390 = vmatpush3.xpose.msra.mxu1 %v92_v14  ;;  %356 = vmatprep.subr.mxu0 %v107_v15 }
  0x3d   :  { %391 = vmatprep.subr.mxu1 %v91_v16 }
  0x3f   :  { %357 = vmatpush3.xpose.msra.mxu0 %v107_v15 }
  0x40   :  { %392 = vmatpush3.xpose.msra.mxu1 %v91_v16  ;;  %358 = vmatprep.subr.mxu0 %v106_v17 }
  0x41   :  { %393 = vmatprep.subr.mxu1 %v90_v18 }
  0x43   :  { %359 = vmatpush3.xpose.msra.mxu0 %v106_v17 }
  0x44   :  { %394 = vmatpush3.xpose.msra.mxu1 %v90_v18  ;;  %360 = vmatprep.subr.mxu0 %v105_v19 }
  0x45   :  { %395 = vmatprep.subr.mxu1 %v89_v20 }
  0x47   :  { %361 = vmatpush3.xpose.msra.mxu0 %v105_v19 }
  0x48   :  { %396 = vmatpush3.xpose.msra.mxu1 %v89_v20  ;;  %362 = vmatprep.subr.mxu0 %v104_v21 }
  0x49   :  { %397 = vmatprep.subr.mxu1 %v88_v22 }
  0x4b   :  { %363 = vmatpush3.xpose.msra.mxu0 %v104_v21 }
  0x4c   :  { %398 = vmatpush3.xpose.msra.mxu1 %v88_v22  ;;  %364 = vmatprep.subr.mxu0 %v103_v23 }
  0x4d   :  { %399 = vmatprep.subr.mxu1 %v87_v24 }
  0x4f   :  { %365 = vmatpush3.xpose.msra.mxu0 %v103_v23 }
  0x50   :  { %400 = vmatpush3.xpose.msra.mxu1 %v87_v24  ;;  %366 = vmatprep.subr.mxu0 %v102_v25 }
  0x51   :  { %401 = vmatprep.subr.mxu1 %v86_v26 }
  0x53   :  { %367 = vmatpush3.xpose.msra.mxu0 %v102_v25 }
  0x54   :  { %402 = vmatpush3.xpose.msra.mxu1 %v86_v26  ;;  %368 = vmatprep.subr.mxu0 %v101_v27 }
  0x55   :  { %403 = vmatprep.subr.mxu1 %v85_v28 }
  0x57   :  { %369 = vmatpush3.xpose.msra.mxu0 %v101_v27 }
  0x58   :  { %404 = vmatpush3.xpose.msra.mxu1 %v85_v28  ;;  %370 = vmatprep.subr.mxu0 %v100_v29 }
  0x59   :  { %405 = vmatprep.subr.mxu1 %v84_v30 }
  0x5b   :  { %371 = vmatpush3.xpose.msra.mxu0 %v100_v29 }
  0x5c   :  { %406 = vmatpush3.xpose.msra.mxu1 %v84_v30  ;;  %372 = vmatprep.subr.mxu0 %v99_v31 }
  0x5d   :  { %407 = vmatprep.subr.mxu1 %v83_v32 }
  0x5f   :  { %373 = vmatpush3.xpose.msra.mxu0 %v99_v31 }
  0x60   :  { %408 = vmatpush3.xpose.msra.mxu1 %v83_v32  ;;  %374 = vmatprep.subr.mxu0 %v98_v33 }
  0x61   :  { %409 = vmatprep.subr.mxu1 %v82_v34 }
  0x63   :  { %375 = vmatpush3.xpose.msra.mxu0 %v98_v33 }
  0x64   :  { %410 = vmatpush3.xpose.msra.mxu1 %v82_v34 }
  0x66   :  { %377 = vmatmul.mubr.f32.vlgmr.msra.gmra.mxu0 %v81_v36 }
  0x67   :  { %412 = vmatmul.mubr.f32.vlgmr.msra.gmra.mxu1 %v72_v35 }
 0x126   :  { %v378_v46 = vpop.f32.mrf.mxu0 }
 0x127   :  { %v413_v47 = vpop.f32.mrf.mxu1  ;;  %v202_v48 = vmul.f32 %v378_v46, %v307_v45 }
 0x128   :  { %v180_v50 = vpop.f32.mrf.mxu0 }
 0x129   :  { %v275_v51 = vadd.f32 %v413_v47, %v202_v48  ;;  %v201_v52 = vmul.f32 %v307_v45, %v180_v50  ;;  %v269_v53 = vpop.f32.mrf.mxu1 }
 0x12b   :  { %v285_v54 = vadd.f32 %v282_v49, %v275_v51  ;;  %v270_v55 = vadd.f32 %v269_v53, %v201_v52 }
 0x12d   :  { %287 = vst [vmem:[#allocation8 + $0x8] sm:$0xff] %v285_v54  ;;  %v284_v56 = vadd.f32 %v282_v49, %v270_v55 }
 0x12f   :  { %286 = vst [vmem:[#allocation8] sm:$0xff] %v284_v56 }
 0x130   :  { %491 = shalt.err (!%p488_p5)
}
 0x131   :  { %299 = dma.vmem_to_hbm [thread:$0]  %s294_s7, 256, %s608_s8, [#allocation4], %s508_s10, %s508_s10, %s509_s11  }
 0x132   :  { %504 = dma.done.wait [#allocation4], 256  }
 0x133   :  { %505 = vsyncadd [#allocation4], 4294967040 }
 0x134   :  { %303 = vsyncpa [#allocation3], 1 }
 0x135   :  { %304 = vsyncpa [#allocation6], 1 }
 0x136   :  { %305 = vsyncpa [#allocation4], 1 }

</bundles_post_ra>
